<compile_context>
chip_gen: v7x
topology: tpu7x:2x2x1
jax: 0.10.0
libtpu: 0.0.40
codegen_flags: <defaults>
</compile_context>

<pallas_src>
import jax
import jax.numpy as jnp
from jax import lax
from jax.experimental import pallas as pl
from jax.experimental.pallas import tpu as pltpu


def _round_up(x, m):
    return ((x + m - 1) // m) * m


def _cdiv(a, b):
    return (a + b - 1) // b


def _pad2(a, rows, cols):
    r, c = a.shape
    if (r, c) == (rows, cols):
        return a
    return jnp.pad(a, ((0, rows - r), (0, cols - c)))


def _pad1(a, n):
    if a.shape[0] == n:
        return a
    return jnp.pad(a, (0, n - a.shape[0]))


def _vmem_budget():
    """(scoped vmem_limit_bytes, tile-planning budget) for the local chip."""
    try:
        phys = int(pltpu.get_tpu_info().vmem_capacity_bytes)
    except Exception:  # conservative fallback (safe on every generation)
        phys = 64 * 1024 * 1024
    limit = (phys * 3) // 4          # ~96 MiB on v5e/v6e, ~48 MiB on v7x
    budget = (limit * 85) // 100     # headroom for compiler-internal scratch
    return limit, budget


def _shrink_candidates(start, align):
    """Descending tile sizes: start, ~start/2, ... down to `align`."""
    out = []
    t = max(start, align)
    while True:
        if not out or out[-1] != t:
            out.append(t)
        if t <= align:
            break
        t = max(_round_up(t // 2, align), align)
    return out


# ---------------------------------------------------------------------------
# Kernels
# ---------------------------------------------------------------------------
def _fc_relu_kernel(x_ref, w_ref, b_ref, o_ref):
    """Full-K tile: out = relu(x @ w.T + b).  x:[tm,K], w:[tn,K], b:[1,tn]."""
    # Weight kept in PyTorch [out, in] layout; contract on its `in` axis.
    # TODO(synk): verify in the Mosaic bundle dump that this trans_b form does
    # not emit vxpose ahead of vmatmul; if it does and the weight is reused,
    # pre-transpose once to [in, out] and switch the w BlockSpec to (tk, tn).
    y = lax.dot_general(
        x_ref[...], w_ref[...],
        dimension_numbers=(((1,), (1,)), ((), ())),
        preferred_element_type=jnp.float32,
    )
    o_ref[...] = jnp.maximum(y + b_ref[...], 0.0).astype(o_ref.dtype)


def _fc_relu_kacc_kernel(x_ref, w_ref, b_ref, o_ref):
    """K-tiled variant: the f32 output block is the accumulator (no scratch)."""
    k = pl.program_id(2)

    @pl.when(k == 0)
    def _():
        o_ref[...] = jnp.zeros_like(o_ref)

    o_ref[...] += lax.dot_general(
        x_ref[...], w_ref[...],
        dimension_numbers=(((1,), (1,)), ((), ())),
        preferred_element_type=jnp.float32,
    )

    @pl.when(k == pl.num_programs(2) - 1)
    def _():
        o_ref[...] = jnp.maximum(o_ref[...] + b_ref[...], 0.0)


# ---------------------------------------------------------------------------
# Wrapper
# ---------------------------------------------------------------------------
def basic_fc(x, weight, bias, *, compute_dtype=jnp.bfloat16,
             tm_pref=512, tn_pref=512, tk_pref=1024, k_block=None):
    """relu(x @ weight.T + bias), matching nn.Linear + F.relu.

    x:      [B, in_features]
    weight: [out, in]   (PyTorch nn.Linear layout; never transposed in HBM)
    bias:   [out]
    compute_dtype: MXU operand dtype (bf16 default, f32 accumulate).  Pass
      jnp.float32 for results closest to the PyTorch f32 module (slower).
    k_block: force K tiling with this block size (mainly for testing).
    """
    B, In = x.shape
    Out, In_w = weight.shape
    assert In_w == In and bias.shape == (Out,)

    out_dtype = jnp.float32                     # module output stays f32
    in_bytes = jnp.dtype(compute_dtype).itemsize
    sublane = 8 * (4 // in_bytes)               # 8 for f32, 16 for bf16

    xc = x.astype(compute_dtype)
    wc = weight.astype(compute_dtype)
    bf = bias.astype(jnp.float32)

    Bp = _round_up(B, sublane)                  # sublane alignment
    Outp = _round_up(Out, 128)                  # lane-dense output stores

    vmem_limit, budget = _vmem_budget()
    cost = pl.CostEstimate(
        flops=2 * B * In * Out,
        transcendentals=0,
        bytes_accessed=(B * In + Out * In) * in_bytes + (Out + B * Out) * 4,
    )

    # ---- grid-free path: genuinely small problems only (medium problems are
    # ---- tiled so both v7x TensorCores get work). ---------------------------
    if k_block is None and Bp <= 128 and Outp <= 512 and In <= 2048:
        x_p = _pad2(xc, Bp, In)
        w_p = _pad2(wc, Outp, In)
        b_p = _pad1(bf, Outp).reshape(1, Outp)
        out_p = pl.pallas_call(
            _fc_relu_kernel,
            out_shape=jax.ShapeDtypeStruct((Bp, Outp), out_dtype),
            in_specs=[pl.BlockSpec(memory_space=pltpu.MemorySpace.VMEM)] * 3,
            out_specs=pl.BlockSpec(memory_space=pltpu.MemorySpace.VMEM),
            compiler_params=pltpu.CompilerParams(vmem_limit_bytes=vmem_limit),
            cost_estimate=cost,
        )(x_p, w_p, b_p)
        return out_p if (Bp, Outp) == (B, Out) else out_p[:B, :Out]

    # ---- tiled paths --------------------------------------------------------
    tm = min(_round_up(tm_pref, sublane), Bp)
    tn = min(_round_up(tn_pref, 128), Outp)

    # Keep >= 2 parallel blocks so the grid shards across 2 TensorCores (v7x).
    if _cdiv(Bp, tm) * _cdiv(Outp, tn) < 2:
        if Bp >= 2 * sublane:
            tm = _round_up(_cdiv(Bp, 2), sublane)
        elif Outp >= 256:
            tn = _round_up(Outp // 2, 128)

    def _fits_2d(tm_, tn_):
        # double-buffered full-K input tiles + double-buffered f32 out tile
        return (2 * (tm_ + tn_) * In * in_bytes
                + 2 * tm_ * tn_ * 4 + 2 * tn_ * 4) <= budget

    use_2d = False
    if k_block is None:
        for tm_c in _shrink_candidates(tm, sublane):
            for tn_c in _shrink_candidates(tn, 128):
                if _fits_2d(tm_c, tn_c):
                    tm, tn, use_2d = tm_c, tn_c, True
                    break
            if use_2d:
                break

    if use_2d:
        # -------- 2-D (M, N) grid, full K per tile: no reduction axis,
        # -------- no accumulator scratch, fused bias + ReLU. -----------------
        Bp_g = _round_up(Bp, tm)
        Outp_g = _round_up(Outp, tn)
        x_p = _pad2(xc, Bp_g, In)
        w_p = _pad2(wc, Outp_g, In)
        b_p = _pad1(bf, Outp_g).reshape(1, Outp_g)
        grid = (Bp_g // tm, Outp_g // tn)
        out_p = pl.pallas_call(
            _fc_relu_kernel,
            out_shape=jax.ShapeDtypeStruct((Bp_g, Outp_g), out_dtype),
            grid_spec=pltpu.PrefetchScalarGridSpec(
                num_scalar_prefetch=0,
                grid=grid,
                in_specs=[
                    pl.BlockSpec((tm, In), lambda i, j: (i, 0)),   # x tile
                    pl.BlockSpec((tn, In), lambda i, j: (j, 0)),   # w tile
                    pl.BlockSpec((1, tn), lambda i, j: (0, j)),    # bias tile
                ],
                out_specs=pl.BlockSpec((tm, tn), lambda i, j: (i, j)),
            ),
            compiler_params=pltpu.CompilerParams(
                dimension_semantics=("parallel", "parallel"),
                vmem_limit_bytes=vmem_limit,
            ),
            cost_estimate=cost,
        )(x_p, w_p, b_p)
        return out_p if (Bp_g, Outp_g) == (B, Out) else out_p[:B, :Out]

    # -------- 3-D (M, N, K) grid: accumulate directly into the f32 output
    # -------- block (resident across k); no VMEM scratch accumulator. --------
    # TODO(synk): if a non-f32 output dtype is ever needed, reintroduce a
    # (tm, tn) f32 VMEM scratch accumulator for that case only.
    tk = k_block if k_block is not None else tk_pref
    tk = min(_round_up(tk, 128), _round_up(In, 128))
    for _ in range(16):
        if (2 * (tm + tn) * tk * in_bytes + 2 * tm * tn * 4) <= budget:
            break
        if tn >= tm and tn > 128:
            tn = _round_up(tn // 2, 128)
        elif tm > sublane:
            tm = max(_round_up(tm // 2, sublane), sublane)
        elif tk > 128:
            tk = _round_up(tk // 2, 128)
        else:
            break

    Inp = _round_up(In, tk)
    Bp_g = _round_up(Bp, tm)
    Outp_g = _round_up(Outp, tn)
    x_p = _pad2(xc, Bp_g, Inp)       # zero K tail => correct accumulation
    w_p = _pad2(wc, Outp_g, Inp)
    b_p = _pad1(bf, Outp_g).reshape(1, Outp_g)
    grid = (Bp_g // tm, Outp_g // tn, Inp // tk)

    out_p = pl.pallas_call(
        _fc_relu_kacc_kernel,
        out_shape=jax.ShapeDtypeStruct((Bp_g, Outp_g), out_dtype),
        grid_spec=pltpu.PrefetchScalarGridSpec(
            num_scalar_prefetch=0,
            grid=grid,
            in_specs=[
                pl.BlockSpec((tm, tk), lambda i, j, k: (i, k)),   # x tile
                pl.BlockSpec((tn, tk), lambda i, j, k: (j, k)),   # w tile [out,in]
                pl.BlockSpec((1, tn), lambda i, j, k: (0, j)),    # bias tile
            ],
            out_specs=pl.BlockSpec((tm, tn), lambda i, j, k: (i, j)),
        ),
        compiler_params=pltpu.CompilerParams(
            dimension_semantics=("parallel", "parallel", "arbitrary"),
            vmem_limit_bytes=vmem_limit,
        ),
        cost_estimate=cost,
    )(x_p, w_p, b_p)
    return out_p if (Bp_g, Outp_g) == (B, Out) else out_p[:B, :Out]


# ---------------------------------------------------------------------------
# Self-test
# ---------------------------------------------------------------------------
if __name__ == "__main__":
    key = jax.random.PRNGKey(0)

    def _torch_init(k, out_ch, in_ch):
        kw, kb = jax.random.split(k)
        bound = 1.0 / (in_ch ** 0.5)
        w = jax.random.uniform(kw, (out_ch, in_ch), jnp.float32, -bound, bound)
        b = jax.random.uniform(kb, (out_ch,), jnp.float32, -bound, bound)
        return w, b

    def _ref(x, w, b):
        return jnp.maximum(
            jnp.dot(x, w.T, precision=jax.lax.Precision.HIGHEST) + b, 0.0)

    # 1) small problem, f32 operands -> grid-free single-tile path ------------
    key, kx, kp = jax.random.split(key, 3)
    B1, In1, Out1 = 8, 32, 64
    w1, b1 = _torch_init(kp, Out1, In1)
    x1 = jax.random.normal(kx, (B1, In1), jnp.float32)
    out1 = jax.block_until_ready(basic_fc(x1, w1, b1, compute_dtype=jnp.float32))
    assert out1.shape == (B1, Out1)
    assert jnp.allclose(out1, _ref(x1, w1, b1), atol=1e-4, rtol=1e-4)

    # 2) medium problem, bf16 operands -> 2-D (M, N) full-K grid --------------
    key, kx, kp = jax.random.split(key, 3)
    B2, In2, Out2 = 256, 512, 384
    w2, b2 = _torch_init(kp, Out2, In2)
    x2 = jax.random.normal(kx, (B2, In2), jnp.float32)
    out2 = jax.block_until_ready(basic_fc(x2, w2, b2))          # bf16 default
    assert out2.shape == (B2, Out2)
    assert jnp.allclose(out2, _ref(x2, w2, b2), atol=3e-2, rtol=3e-2)

    # 3) forced K tiling, bf16 operands -> 3-D grid, output-as-accumulator ----
    key, kx, kp = jax.random.split(key, 3)
    B3, In3, Out3 = 128, 1024, 256
    w3, b3 = _torch_init(kp, Out3, In3)
    x3 = jax.random.normal(kx, (B3, In3), jnp.float32)
    out3 = jax.block_until_ready(basic_fc(x3, w3, b3, k_block=256))
    assert out3.shape == (B3, Out3)
    assert jnp.allclose(out3, _ref(x3, w3, b3), atol=3e-2, rtol=3e-2)

    print("KERNEL_OK")
</pallas_src>

<mosaic_0001>
module attributes {stable_mosaic.version = 11 : i64} {
  func.func @_fc_relu_kernel(%arg0: memref<8x32xf32, #tpu.memory_space<vmem>>, %arg1: memref<128x32xf32, #tpu.memory_space<vmem>>, %arg2: memref<1x128xf32, #tpu.memory_space<vmem>>, %arg3: memref<8x128xf32, #tpu.memory_space<vmem>>) attributes {dimension_semantics = [], scalar_prefetch = 0 : i64, scratch_operands = 0 : i64, tpu.core_type = #tpu.core_type<tc>} {
    %c0 = arith.constant 0 : index
    %c0_0 = arith.constant 0 : index
    %0 = vector.load %arg0[%c0, %c0_0] : memref<8x32xf32, #tpu.memory_space<vmem>>, vector<8x32xf32>
    %c0_1 = arith.constant 0 : index
    %c0_2 = arith.constant 0 : index
    %1 = vector.load %arg1[%c0_1, %c0_2] : memref<128x32xf32, #tpu.memory_space<vmem>>, vector<128x32xf32>
    %cst = arith.constant dense<0.000000e+00> : vector<8x128xf32>
    %2 = tpu.matmul %0, %1, %cst {dimension_numbers = #tpu.dot_dimension_numbers<[1], [1], [0], [0], [0, 0, 1, 0], [], []>} : vector<8x32xf32>, vector<128x32xf32>, vector<8x128xf32> -> vector<8x128xf32>
    %c0_3 = arith.constant 0 : index
    %c0_4 = arith.constant 0 : index
    %3 = vector.load %arg2[%c0_3, %c0_4] : memref<1x128xf32, #tpu.memory_space<vmem>>, vector<1x128xf32>
    %4 = vector.broadcast %3 : vector<1x128xf32> to vector<8x128xf32>
    %5 = arith.addf %2, %4 : vector<8x128xf32>
    %cst_5 = arith.constant 0.000000e+00 : f32
    %6 = vector.broadcast %cst_5 : f32 to vector<8x128xf32>
    %7 = arith.maximumf %5, %6 : vector<8x128xf32>
    %c0_6 = arith.constant 0 : index
    %c0_7 = arith.constant 0 : index
    %8 = vector.load %arg3[%c0_6, %c0_7] : memref<8x128xf32, #tpu.memory_space<vmem>>, vector<8x128xf32>
    tpu.vector_store %arg3[%c0_6, %c0_7], %7 {strides = array<i32>} : memref<8x128xf32, #tpu.memory_space<vmem>>, vector<8x128xf32>,
    return
  }
}

</mosaic_0001>

<bundles_post_ra>
// kernel: tpu_custom_call.1
= control target key start
LH: loop header
LB: loop body
LE: loop exit
PB: predicated region body
PF: predicated region fallthrough
CT: control target
= control target key end

     0   :  { %vm39_vm0 = vcmask 261120   ;;  %v307_v2 = vmov 0.0|0.0   ;;  %vm308_vm2 = vmmov 0   ;;  %v309_v5 = vmov 0.0   ;;  %s420_s0 = inlined_call_operand.vmem [shape: f32[8,32], index: 0, kind: input, shape index: {}]   ;;  %s421_s1 = inlined_call_operand.vmem [shape: f32[128,32], index: 1, kind: input, shape index: {}]   ;;  %s422_s2 = inlined_call_operand.vmem [shape: f32[1,128], index: 2, kind: input, shape index: {}]   ;;  %s423_s3 = inlined_call_operand.hbm [shape: f32[8,128], index: 3, kind: output, shape index: {}]  }
   0x1   :  { %v16_v0 = vld [vmem:[%s421_s1] sm:$0xff]  ;;  %v17_v1 = vld [vmem:[%s421_s1 + $0x8] sm:$0xff]  ;;  %247 = vmatprep.subr.bf16.mxu0 %v307_v2  ;;  %vm339_vm1 = vmpackc.low %vm39_vm0, %vm39_vm0  ;;  %244 = vmatprep.mubr.msk.f32.mxu0 %vm308_vm2, %v309_v5 }
   0x2   :  { %v248_v3 = vpack.c.bf16 %v17_v1, %v16_v0  ;;  %v18_v6 = vld [vmem:[%s421_s1 + $0x10] sm:$0xff]  ;;  %v19_v7 = vld [vmem:[%s421_s1 + $0x18] sm:$0xff] }
   0x4   :  { %250 = vmatpush3.bf16.xpose.msk.msra.mxu0 %vm339_vm1, %v248_v3 }
   0x5   :  { %251 = vmatprep.subr.bf16.mxu0 %v307_v2 }
   0x6   :  { %8 = vsyncpa [#allocation3], 0  ;;  %v252_v8 = vpack.c.bf16 %v19_v7, %v18_v6  ;;  %v20_v9 = vld [vmem:[%s421_s1 + $0x20] sm:$0xff]  ;;  %v21_v10 = vld [vmem:[%s421_s1 + $0x28] sm:$0xff]  ;;  %s310_s21 = smov [#allocation2]  }
   0x7   :  { %v256_v11 = vpack.c.bf16 %v21_v10, %v20_v9  ;;  %v22_v12 = vld [vmem:[%s421_s1 + $0x30] sm:$0xff]  ;;  %v23_v13 = vld [vmem:[%s421_s1 + $0x38] sm:$0xff]  ;;  %v24_v15 = vld [vmem:[%s421_s1 + $0x40] sm:$0xff]  ;;  %s169_s22 = sshll.u32 %s310_s21, 4  ;;  %s170_s22 = int_to_ptr.vmem [resolvable:$true] %s169_s22 }
   0x8   :  { %v260_v14 = vpack.c.bf16 %v23_v13, %v22_v12  ;;  %v25_v16 = vld [vmem:[%s421_s1 + $0x48] sm:$0xff]  ;;  %v26_v18 = vld [vmem:[%s421_s1 + $0x50] sm:$0xff]  ;;  %v27_v19 = vld [vmem:[%s421_s1 + $0x58] sm:$0xff]  ;;  %p288_p1 = scmp.lt.s32.totalorder %s170_s22, %s170_s22 }
   0x9   :  { %v264_v17 = vpack.c.bf16 %v25_v16, %v24_v15  ;;  %v268_v20 = vpack.c.bf16 %v27_v19, %v26_v18  ;;  %v28_v21 = vld [vmem:[%s421_s1 + $0x60] sm:$0xff]  ;;  %v29_v22 = vld [vmem:[%s421_s1 + $0x68] sm:$0xff]  ;;  %v30_v24 = vld [vmem:[%s421_s1 + $0x70] sm:$0xff] }
   0xa   :  { %v272_v23 = vpack.c.bf16 %v29_v22, %v28_v21  ;;  %v31_v25 = vld [vmem:[%s421_s1 + $0x78] sm:$0xff]  ;;  %v15_v27 = vld [vmem:[%s420_s0] sm:$0xff]  ;;  %s283_s1 = scalar_lea.vmem %s170_s22, 128 }
   0xb   :  { %v276_v26 = vpack.c.bf16 %v31_v25, %v30_v24  ;;  %v177_v28 = vld [vmem:[%s422_s2] ss:$0 sm:$0xff]  ;;  %p284_p0 = scmp.ne.s32.totalorder %s170_s22, %s283_s1  ;;  %p289_p2 = scmp.lt.s32.totalorder %s283_s1, %s283_s1 }
   0xc   :  { %254 = vmatpush3.bf16.xpose.msk.msra.mxu0 %vm339_vm1, %v252_v8 }
   0xd   :  { %255 = vmatprep.subr.bf16.mxu0 %v307_v2  ;;  %p290_p3 = por %p289_p2, %p288_p1 }
   0xf   :  { %p291_p4 = pnand %p290_p3, %p284_p0 }
  0x14   :  { %258 = vmatpush3.bf16.xpose.msk.msra.mxu0 %vm339_vm1, %v256_v11 }
  0x15   :  { %259 = vmatprep.subr.bf16.mxu0 %v307_v2 }
  0x1c   :  { %262 = vmatpush3.bf16.xpose.msk.msra.mxu0 %vm339_vm1, %v260_v14 }
  0x1d   :  { %263 = vmatprep.subr.bf16.mxu0 %v307_v2 }
  0x24   :  { %266 = vmatpush3.bf16.xpose.msk.msra.mxu0 %vm339_vm1, %v264_v17 }
  0x25   :  { %267 = vmatprep.subr.bf16.mxu0 %v307_v2 }
  0x2c   :  { %270 = vmatpush3.bf16.xpose.msk.msra.mxu0 %vm339_vm1, %v268_v20 }
  0x2d   :  { %271 = vmatprep.subr.bf16.mxu0 %v307_v2 }
  0x34   :  { %274 = vmatpush3.bf16.xpose.msk.msra.mxu0 %vm339_vm1, %v272_v23 }
  0x35   :  { %275 = vmatprep.subr.bf16.mxu0 %v307_v2 }
  0x3c   :  { %278 = vmatpush3.bf16.xpose.msk.msra.mxu0 %vm339_vm1, %v276_v26 }
  0x43   :  { %245 = vmatmul.mubr.msk.f32.vlgmr.msra.gmra.mrb[0].mxu0 %vm39_vm0, %v15_v27 }
 0x116   :  { %v157_v29 = vpop.f32.mrb[0].mxu0 }
 0x117   :  { %v158_v30 = vadd.f32 %v177_v28, %v157_v29  ;;  %v246_v31 = vpop.f32.mrb[1].mxu0 }
 0x119   :  { %v161_v32 = vmax.f32 %v158_v30, 0.0 }
 0x11b   :  { %162 = vst [vmem:[#allocation2] sm:$0xff] %v161_v32 }
 0x11c   :  { %294 = shalt.err (!%p291_p4)
}
 0x11d   :  { %s295_s24 = scalar_lea.hbm %s423_s3, 128 }
 0x11e   :  { %p296_p5 = scmp.ne.s32.totalorder %s423_s3, %s295_s24  ;;  %p299_p6 = scmp.lt.u32.totalorder %s295_s24, %s423_s3 }
 0x120   :  { %p301_p7 = pnand %p299_p6, %p296_p5 }
 0x122   :  { %304 = shalt.err (!%p301_p7)
}
 0x123   :  { %172 = dma.vmem_to_hbm [thread:$0]  %s170_s22, 128, %s423_s3, [#allocation3]  }
 0x124   :  { %305 = dma.done.wait [#allocation3], 128  }
 0x125   :  { %306 = vsyncadd [#allocation3], 4294967168 }
 0x126   :  { %176 = vsyncpa [#allocation3], 1 }

</bundles_post_ra>
